<compile_context>
chip_gen: v7x
topology: tpu7x:2x2x1
jax: 0.10.0
libtpu: 0.0.40
codegen_flags: <defaults>
</compile_context>

<pallas_src>
import jax
import jax.numpy as jnp
from jax.experimental import pallas as pl
from jax.experimental.pallas import tpu as pltpu


def _onehot_gather_kernel(perm_ref, q_ref, out_ref):
    """out[r, :] = q[perm[r], :] for all rows r, via a single one-hot MXU matmul.

    perm_ref : (R, 1) int32  flattened (batch*seq) row indices, R padded to a multiple of 8.
    q_ref    : (S, H) f32    concatenated query-embedding table (vreg-resident, ~4 vregs).
    out_ref  : (R, H) f32    gathered / batch-broadcast rows (lane/sublane aligned slab).
    """
    R = out_ref.shape[0]
    S = q_ref.shape[0]

    # One-hot selection matrix P[r, k] = (perm[r] == k): ~4 VPU compare vregs, no XLU work.
    col = jax.lax.broadcasted_iota(jnp.int32, (R, S), dimension=1)     # (R, S)
    onehot = (perm_ref[...] == col).astype(q_ref.dtype)                # (R, S) one-hot rows

    # Single MXU push (the MXU is otherwise idle here).  HIGHEST precision keeps the
    # f32 gather bit-exact: each output row is 1.0 * one table row + 0.0 * the rest.
    out_ref[...] = jnp.dot(
        onehot,
        q_ref[...],
        preferred_element_type=jnp.float32,
        precision=jax.lax.Precision.HIGHEST,
    ).astype(out_ref.dtype)


def permute_broadcast(q_concat: jax.Array, perm: jax.Array, batch: int) -> jax.Array:
    """q_concat: (S, H) concatenated query embeddings, perm: (B, S) int.
       Returns inputs: (B, S, H) = q_concat[perm[b]] for each b."""
    S, H = q_concat.shape
    rows = batch * S
    rows_pad = ((rows + 7) // 8) * 8        # 60 -> 64: unmasked full-sublane stores

    # Flatten (B, S) -> (B*S, 1) so batch and sequence share the sublane axis; pad rows
    # with index 0 (harmless gather of row 0, sliced off below).
    perm_flat = perm.astype(jnp.int32).reshape(rows, 1)
    if rows_pad != rows:
        perm_flat = jnp.pad(perm_flat, ((0, rows_pad - rows), (0, 0)))

    # Gridless single-TC invocation: full arrays in VMEM (perm <1 KB, table ~3.8 KB,
    # output ~8 KB).  Block shapes equal the full array extents -> (8, 128) rule is
    # satisfied; no pipelining, no megacore split (would regress at this size).
    out = pl.pallas_call(
        _onehot_gather_kernel,
        out_shape=jax.ShapeDtypeStruct((rows_pad, H), q_concat.dtype),
        in_specs=[
            pl.BlockSpec(memory_space=pltpu.MemorySpace.VMEM),   # perm_flat
            pl.BlockSpec(memory_space=pltpu.MemorySpace.VMEM),   # q_concat
        ],
        out_specs=pl.BlockSpec(memory_space=pltpu.MemorySpace.VMEM),
    )(perm_flat, q_concat)

    return out[:rows].reshape(batch, S, H)


@jax.jit
def adaptor_list_forward(camera_images, q_route, q_speed):
    """JAX/Pallas equivalent of AdaptorList(driving=DrivingAdaptor(...)).forward(example)."""
    b = camera_images.shape[0]

    # ---- DrivingAdaptor.forward: concat query embeds, expand to batch, all-True mask ----
    q_concat = jnp.concatenate([q_route[0], q_speed[0]], axis=0)      # (S, H), S = 20 + 10
    S, H = q_concat.shape
    driving_inputs = jnp.broadcast_to(q_concat[None], (b, S, H))      # pre-permutation tensor
    inputs_mask = jnp.ones((b, S), dtype=jnp.bool_)                   # torch.ones_like(...[:, :, 0])

    # ---- AdaptorList.forward permutation bookkeeping (faithful to the torch code) ----
    # TODO(synk): the stable descending argsort of the token mask stays in XLA (jnp.argsort);
    # with the all-True mask it constant-folds to the identity permutation.
    rand_perm = jnp.broadcast_to(jnp.arange(S, dtype=jnp.int32)[None], (b, S))
    mask_bytes = jnp.take_along_axis(inputs_mask, rand_perm, axis=1).astype(jnp.int32)
    valid_perm = jnp.argsort(-mask_bytes, axis=-1).astype(jnp.int32)  # stable descending argsort
    perm = jnp.take_along_axis(rand_perm, valid_perm, axis=1)         # identity here

    # ---- hot path in Pallas: inputs[b] = concat_queries gathered by perm[b] ----
    inputs = permute_broadcast(q_concat, perm, b)
    permuted_mask = jnp.take_along_axis(inputs_mask, perm, axis=1)

    return {
        "driving_inputs": driving_inputs,
        "driving_inputs_mask": inputs_mask,
        "inputs": inputs,
        "inputs_mask": permuted_mask,
        "perm": perm,
        "split_sizes": jnp.array([S], dtype=jnp.int32),
    }


if __name__ == "__main__":
    key = jax.random.PRNGKey(0)
    k_img, k_route, k_speed, k_h1, k_h2 = jax.random.split(key, 5)

    # Small shapes consistent with the module.
    B, C, IMG = 2, 3, 16
    HIDDEN, MLP = 32, 256
    FUTURE_WPS, FUTURE_SPEED_WPS = 20, 10
    S_TOTAL = FUTURE_WPS + FUTURE_SPEED_WPS

    camera_images = jax.random.normal(k_img, (B, C, IMG, IMG), dtype=jnp.float32)

    # Deterministic parameter init (same shapes as DrivingAdaptor.__init__).
    query_embeds_wps = 0.02 * jax.random.normal(k_route, (1, FUTURE_WPS, HIDDEN), dtype=jnp.float32)
    query_embeds_speed = 0.02 * jax.random.normal(k_speed, (1, FUTURE_SPEED_WPS, HIDDEN), dtype=jnp.float32)
    # Head MLP weights exist in __init__ but are only used by get_predictions/compute_loss,
    # not by forward(); initialized here for completeness and left unused.
    route_head_w1 = jax.random.normal(k_h1, (HIDDEN, MLP), dtype=jnp.float32) / jnp.sqrt(HIDDEN)
    speed_head_w1 = jax.random.normal(k_h2, (HIDDEN, MLP), dtype=jnp.float32) / jnp.sqrt(HIDDEN)

    out = adaptor_list_forward(camera_images, query_embeds_wps, query_embeds_speed)
    out = jax.block_until_ready(out)

    # Reference check (pure JAX): perm is the identity (mask is all True), so `inputs`
    # must equal the broadcast concatenation of the query embeddings.
    q_concat = jnp.concatenate([query_embeds_wps[0], query_embeds_speed[0]], axis=0)
    ref_inputs = jnp.broadcast_to(q_concat[None], (B, S_TOTAL, HIDDEN))
    assert out["inputs"].shape == (B, S_TOTAL, HIDDEN)
    assert out["inputs_mask"].shape == (B, S_TOTAL) and bool(jnp.all(out["inputs_mask"]))
    assert bool(jnp.all(out["perm"] == jnp.arange(S_TOTAL, dtype=jnp.int32)[None]))
    assert jnp.allclose(out["inputs"], ref_inputs, atol=1e-6)
    assert jnp.allclose(out["driving_inputs"], ref_inputs, atol=1e-6)
    assert int(out["split_sizes"][0]) == S_TOTAL

    # Extra check that the one-hot MXU gather handles a NON-identity permutation
    # (exercises the generic path the module would take if any mask entries were False).
    rev = jnp.broadcast_to(jnp.arange(S_TOTAL - 1, -1, -1, dtype=jnp.int32)[None], (B, S_TOTAL))
    out_rev = jax.block_until_ready(permute_broadcast(q_concat, rev, B))
    ref_rev = jnp.broadcast_to(q_concat[::-1][None], (B, S_TOTAL, HIDDEN))
    assert jnp.allclose(out_rev, ref_rev, atol=1e-6)

    print("KERNEL_OK")
</pallas_src>

<mosaic_0001>
module attributes {stable_mosaic.version = 11 : i64} {
  func.func @_onehot_gather_kernel(%arg0: memref<64x1xi32, #tpu.memory_space<vmem>>, %arg1: memref<30x32xf32, #tpu.memory_space<vmem>>, %arg2: memref<64x32xf32, #tpu.memory_space<vmem>>) attributes {dimension_semantics = [], scalar_prefetch = 0 : i64, scratch_operands = 0 : i64, tpu.core_type = #tpu.core_type<tc>} {
    %0 = tpu.iota {dimensions = array<i32: 1>} : vector<64x30xi32>
    %c0 = arith.constant 0 : index
    %c0_0 = arith.constant 0 : index
    %1 = vector.load %arg0[%c0, %c0_0] : memref<64x1xi32, #tpu.memory_space<vmem>>, vector<64x1xi32>
    %2 = vector.broadcast %1 : vector<64x1xi32> to vector<64x30xi32>
    %3 = arith.cmpi eq, %2, %0 : vector<64x30xi32>
    %4 = arith.extui %3 : vector<64x30xi1> to vector<64x30xi32>
    %5 = arith.sitofp %4 : vector<64x30xi32> to vector<64x30xf32>
    %c0_1 = arith.constant 0 : index
    %c0_2 = arith.constant 0 : index
    %6 = vector.load %arg1[%c0_1, %c0_2] : memref<30x32xf32, #tpu.memory_space<vmem>>, vector<30x32xf32>
    %cst = arith.constant dense<0.000000e+00> : vector<64x32xf32>
    %7 = tpu.matmul %5, %6, %cst {dimension_numbers = #tpu.dot_dimension_numbers<[1], [0], [0], [1], [0, 0, 1, 1], [], []>, precision = #tpu.contract_precision<fp32>} : vector<64x30xf32>, vector<30x32xf32>, vector<64x32xf32> -> vector<64x32xf32>
    %c0_3 = arith.constant 0 : index
    %c0_4 = arith.constant 0 : index
    %8 = vector.load %arg2[%c0_3, %c0_4] : memref<64x32xf32, #tpu.memory_space<vmem>>, vector<64x32xf32>
    tpu.vector_store %arg2[%c0_3, %c0_4], %7 {strides = array<i32>} : memref<64x32xf32, #tpu.memory_space<vmem>>, vector<64x32xf32>,
    return
  }
}

</mosaic_0001>

<bundles_post_ra>
// kernel: adaptor_list_forward.1
= control target key start
LH: loop header
LB: loop body
LE: loop exit
PB: predicated region body
PF: predicated region fallthrough
CT: control target
= control target key end

     0   :  { %v1217_v0 = vmov 0   ;;  %vm98_vm0 = vcmask 1045504   ;;  %v11_v42 = vlaneseq  ;;  %vm73_vm1 = vcmask 244736   ;;  %s1462_s0 = inlined_call_operand.vmem [shape: s32[64,1], index: 0, kind: input, shape index: {}]   ;;  %s1463_s1 = inlined_call_operand.vmem [shape: f32[30,32], index: 1, kind: input, shape index: {}]   ;;  %s1464_s2 = inlined_call_operand.vmem [shape: f32[64,32], index: 2, kind: output, shape index: {}]  }
   0x1   :  { %1216 = vset.pattern.permute.xlu1 %v1217_v0  ;;  %1215 = vset.pattern.permute.xlu0 %v1217_v0  ;;  %v15_v1 = vld [vmem:[%s1462_s0 + $0x10] sm:$0xff]  ;;  %v13_v2 = vld [vmem:[%s1462_s0] sm:$0xff]  ;;  %v16_v3 = vld [vmem:[%s1462_s0 + $0x18] sm:$0xff]  ;;  %v1218_v46 = vmov 0.0   ;;  %vm888_vm10 = vcmask 261120  }
   0x2   :  { %28 = vperm.xlu1 %1216, %v15_v1   ;;  %22 = vperm.xlu0 %1215, %v13_v2   ;;  %v14_v4 = vld [vmem:[%s1462_s0 + $0x8] sm:$0xff]  ;;  %v69_v5 = vld [vmem:[%s1463_s1] sm:$0xff]  ;;  %v71_v8 = vld [vmem:[%s1463_s1 + $0x10] sm:$0xff]  ;;  %v12_v43 = vand.u32 127, %v11_v42 }
   0x3   :  { %v70_v6 = vld [vmem:[%s1463_s1 + $0x8] sm:$0xff]  ;;  %v103_v7 = vand.u32 4294901760, %v69_v5  ;;  %v72_v9 = vld [vmem:[%s1463_s1 + $0x18] sm:$0x3f]  ;;  %v109_v12 = vand.u32 4294901760, %v71_v8  ;;  %v17_v15 = vld [vmem:[%s1462_s0 + $0x20] sm:$0xff] }
   0x4   :  { %v106_v10 = vand.u32 4294901760, %v70_v6  ;;  %v100_v11 = vsel %vm98_vm0, %v72_v9, 0  ;;  %v18_v14 = vld [vmem:[%s1462_s0 + $0x28] sm:$0xff]  ;;  %v20_v18 = vld [vmem:[%s1462_s0 + $0x38] sm:$0xff]  ;;  %v19_v19 = vld [vmem:[%s1462_s0 + $0x30] sm:$0xff] }
   0x5   :  { %v112_v13 = vand.u32 4294901760, %v100_v11  ;;  %v253_v20 = vsub.f32 %v69_v5, %v103_v7  ;;  %v267_v27 = vsub.f32 %v71_v8, %v109_v12 }
   0x6   :  { %31 = vperm.xlu1 %1216, %v16_v3   ;;  %25 = vperm.xlu0 %1215, %v14_v4   ;;  %v1264_v16 = vpack.c.bf16 %v106_v10, %v103_v7  ;;  %v260_v21 = vsub.f32 %v70_v6, %v106_v10 }
   0x7   :  { %v1266_v17 = vpack.c.bf16 %v112_v13, %v109_v12  ;;  %v254_v22 = vand.u32 4294901760, %v253_v20  ;;  %v274_v28 = vsub.f32 %v100_v11, %v112_v13  ;;  %v268_v31 = vand.u32 4294901760, %v267_v27 }
   0x8   :  { %1150 = vmatprep.subr.bf16.mxu0 %v1264_v16  ;;  %1126 = vmatprep.subr.bf16.mxu1 %v1264_v16  ;;  %v261_v23 = vand.u32 4294901760, %v260_v21  ;;  %v1292_v40 = vpack.c.bf16 %v260_v21, %v253_v20 }
   0x9   :  { %1152 = vmatpush3.bf16.msra.mxu0 %v1264_v16  ;;  %1128 = vmatpush3.bf16.msra.mxu1 %v1264_v16  ;;  %v255_v24 = vsub.f32 %v253_v20, %v254_v22  ;;  %v275_v32 = vand.u32 4294901760, %v274_v28  ;;  %v269_v34 = vsub.f32 %v267_v27, %v268_v31  ;;  %v1294_v41 = vpack.c.bf16 %v274_v28, %v267_v27 }
   0xa   :  { %37 = vperm.xlu1 %1216, %v18_v14   ;;  %34 = vperm.xlu0 %1215, %v17_v15   ;;  %v262_v25 = vsub.f32 %v260_v21, %v261_v23  ;;  %v1282_v26 = vpack.c.bf16 %v261_v23, %v254_v22 }
   0xb   :  { %1154 = vmatprep.subr.bf16.mxu0 %v1266_v17  ;;  %1130 = vmatprep.subr.bf16.mxu1 %v1266_v17  ;;  %v256_v29 = vand.u32 4294901760, %v255_v24  ;;  %v276_v35 = vsub.f32 %v274_v28, %v275_v32  ;;  %v1287_v36 = vpack.c.bf16 %v275_v32, %v268_v31  ;;  %v270_v37 = vand.u32 4294901760, %v269_v34 }
   0xc   :  { %v263_v30 = vand.u32 4294901760, %v262_v25 }
   0xd   :  { %1156 = vmatpush3.bf16.msra.mxu0 %v1266_v17  ;;  %1132 = vmatpush3.bf16.msra.mxu1 %v1266_v17  ;;  %v277_v38 = vand.u32 4294901760, %v276_v35 }
   0xe   :  { %43 = vperm.xlu1 %1216, %v20_v18   ;;  %40 = vperm.xlu0 %1215, %v19_v19   ;;  %v1285_v33 = vpack.c.bf16 %v263_v30, %v256_v29 }
   0xf   :  { %1158 = vmatprep.subr.bf16.mxu0 %v1282_v26  ;;  %v1290_v39 = vpack.c.bf16 %v277_v38, %v270_v37 }
  0x10   :  { %1134 = vmatprep.subr.bf16.mxu1 %v1285_v33 }
  0x81   :  { %v29_v44 = vpop.permute.xlu1 %28  ;;  %v23_v45 = vpop.permute.xlu0 %22 }
  0x82   :  { %vm47_vm2 = vcmp.eq.s32.totalorder %v29_v44, %v12_v43  ;;  %vm45_vm3 = vcmp.eq.s32.totalorder %v23_v45, %v12_v43 }
  0x83   :  { %v1296_v47 = vsel %vm47_vm2, 1.0, %v1218_v46  ;;  %v1298_v48 = vsel %vm45_vm3, 1.0, %v1218_v46 }
  0x84   :  { %v81_v49 = vsel %vm73_vm1, %v1296_v47, 0  ;;  %v75_v50 = vsel %vm73_vm1, %v1298_v48, 0 }
  0x85   :  { %v1304_v51 = vsub.f32 %v81_v49, %v81_v49  ;;  %v1306_v52 = vsub.f32 %v75_v50, %v75_v50  ;;  %v32_v53 = vpop.permute.xlu1 %31  ;;  %v26_v54 = vpop.permute.xlu0 %25 }
  0x86   :  { %vm48_vm4 = vcmp.eq.s32.totalorder %v32_v53, %v12_v43  ;;  %vm46_vm5 = vcmp.eq.s32.totalorder %v26_v54, %v12_v43 }
  0x87   :  { %v1308_v55 = vsel %vm48_vm4, 1.0, %v1218_v46  ;;  %v1310_v56 = vsel %vm46_vm5, 1.0, %v1218_v46  ;;  %v173_v57 = vand.u32 4294901760, %v1306_v52  ;;  %v193_v60 = vand.u32 4294901760, %v1304_v51 }
  0x88   :  { %v84_v58 = vsel %vm73_vm1, %v1308_v55, 0  ;;  %v78_v59 = vsel %vm73_vm1, %v1310_v56, 0 }
  0x89   :  { %v1318_v61 = vsub.f32 %v84_v58, %v84_v58  ;;  %v1320_v62 = vsub.f32 %v78_v59, %v78_v59  ;;  %v38_v63 = vpop.permute.xlu1 %37  ;;  %1073 = vmatprep.mubr.f32.mxu0 %v173_v57  ;;  %v35_v0 = vpop.permute.xlu0 %34  ;;  %v174_v1 = vsub.f32 %v1306_v52, %v173_v57  ;;  %v194_v9 = vsub.f32 %v1304_v51, %v193_v60 }
  0x8a   :  { %vm50_vm6 = vcmp.eq.s32.totalorder %v38_v63, %v12_v43  ;;  %vm49_vm7 = vcmp.eq.s32.totalorder %v35_v0, %v12_v43 }
  0x8b   :  { %v1323_v2 = vsel %vm50_vm6, 1.0, %v1218_v46  ;;  %v1325_v3 = vsel %vm49_vm7, 1.0, %v1218_v46  ;;  %v175_v4 = vand.u32 4294901760, %v174_v1  ;;  %v183_v5 = vand.u32 4294901760, %v1320_v62 }
  0x8c   :  { %v90_v6 = vsel %vm73_vm1, %v1323_v2, 0  ;;  %v87_v7 = vsel %vm73_vm1, %v1325_v3, 0  ;;  %v203_v8 = vand.u32 4294901760, %v1318_v61  ;;  %v195_v24 = vand.u32 4294901760, %v194_v9 }
  0x8d   :  { %v1334_v10 = vsub.f32 %v90_v6, %v90_v6  ;;  %v1336_v11 = vsub.f32 %v87_v7, %v87_v7  ;;  %v44_v12 = vpop.permute.xlu1 %43  ;;  %1013 = vmatprep.mubr.f32.mxu1 %v175_v4  ;;  %1074 = vmatmul.mubr.f32.vlgmr.msra.gmra.mrb[0].mxu0 %v183_v5  ;;  %v41_v13 = vpop.permute.xlu0 %40  ;;  %v184_v14 = vsub.f32 %v1320_v62, %v183_v5 }
  0x8e   :  { %vm52_vm8 = vcmp.eq.s32.totalorder %v44_v12, %v12_v43  ;;  %vm51_vm9 = vcmp.eq.s32.totalorder %v41_v13, %v12_v43  ;;  %1076 = vmatprep.mubr.f32.mxu0 %v193_v60  ;;  %1160 = vmatpush3.bf16.msra.mxu0 %v1282_v26  ;;  %v204_v15 = vsub.f32 %v1318_v61, %v203_v8 }
  0x8f   :  { %v1341_v18 = vsel %vm52_vm8, 1.0, %v1218_v46  ;;  %v1343_v19 = vsel %vm51_vm9, 1.0, %v1218_v46  ;;  %v185_v20 = vand.u32 4294901760, %v184_v14  ;;  %v213_v21 = vand.u32 4294901760, %v1336_v11  ;;  %1162 = vmatprep.subr.bf16.mxu0 %v1287_v36 }
  0x90   :  { %v96_v22 = vsel %vm73_vm1, %v1341_v18, 0  ;;  %v93_v23 = vsel %vm73_vm1, %v1343_v19, 0  ;;  %v223_v25 = vand.u32 4294901760, %v1334_v10  ;;  %v205_v29 = vand.u32 4294901760, %v204_v15 }
  0x91   :  { %v1352_v26 = vsub.f32 %v96_v22, %v96_v22  ;;  %v1354_v27 = vsub.f32 %v93_v23, %v93_v23  ;;  %1014 = vmatmul.mubr.f32.vlgmr.msra.gmra.mrb[0].mxu1 %v185_v20  ;;  %1077 = vmatmul.mubr.f32.gmra.mrb[2].mxu0 %v203_v8  ;;  %v214_v28 = vsub.f32 %v1336_v11, %v213_v21 }
  0x92   :  { %1136 = vmatpush3.bf16.msra.mxu1 %v1285_v33  ;;  %1016 = vmatprep.mubr.f32.mxu1 %v195_v24  ;;  %v224_v32 = vsub.f32 %v1334_v10, %v223_v25 }
  0x93   :  { %1079 = vmatprep.mubr.f32.mxu0 %v213_v21  ;;  %v215_v30 = vand.u32 4294901760, %v214_v28  ;;  %v233_v31 = vand.u32 4294901760, %v1354_v27  ;;  %1138 = vmatprep.subr.bf16.mxu1 %v1290_v39  ;;  %v243_v34 = vand.u32 4294901760, %v1352_v26 }
  0x94   :  { %1164 = vmatpush3.bf16.msra.mxu0 %v1287_v36  ;;  %v225_v33 = vand.u32 4294901760, %v224_v32 }
  0x95   :  { %1017 = vmatmul.mubr.f32.gmra.mrb[2].mxu1 %v205_v29  ;;  %1080 = vmatmul.mubr.f32.gmra.mrb[4].mxu0 %v223_v25  ;;  %v234_v35 = vsub.f32 %v1354_v27, %v233_v31  ;;  %v244_v38 = vsub.f32 %v1352_v26, %v243_v34 }
  0x96   :  { %1019 = vmatprep.mubr.f32.mxu1 %v215_v30  ;;  %1082 = vmatprep.mubr.f32.mxu0 %v233_v31 }
  0x97   :  { %1140 = vmatpush3.bf16.msra.mxu1 %v1290_v39  ;;  %v235_v37 = vand.u32 4294901760, %v234_v35  ;;  %1166 = vmatprep.subr.bf16.mxu0 %v1264_v16  ;;  %v245_v36 = vand.u32 4294901760, %v244_v38 }
  0x98   :  { %1142 = vmatprep.subr.bf16.mxu1 %v1292_v40 }
  0x99   :  { %1020 = vmatmul.mubr.f32.gmra.mrb[4].mxu1 %v225_v33  ;;  %1083 = vmatmul.mubr.f32.gmra.mrb[6].mxu0 %v243_v34 }
  0x9a   :  { %1022 = vmatprep.mubr.f32.mxu1 %v235_v37  ;;  %1093 = vmatprep.mubr.msk.f32.mxu0 %vm73_vm1, %v1298_v48 }
  0x9d   :  { %1023 = vmatmul.mubr.f32.gmra.mrb[6].mxu1 %v245_v36  ;;  %1094 = vmatmul.mubr.msk.f32.vlgmr.msra.gmra.mrb[0].mxu0 %vm73_vm1, %v1310_v56 }
  0x9e   :  { %1033 = vmatprep.mubr.msk.f32.mxu1 %vm73_vm1, %v1298_v48  ;;  %1096 = vmatprep.mubr.msk.f32.mxu0 %vm73_vm1, %v1296_v47 }
  0x9f   :  { %1168 = vmatpush3.bf16.msra.mxu0 %v1264_v16 }
  0xa0   :  { %1170 = vmatprep.subr.bf16.mxu0 %v1266_v17 }
  0xa1   :  { %1034 = vmatmul.mubr.msk.f32.vlgmr.msra.gmra.mrb[0].mxu1 %vm73_vm1, %v1310_v56  ;;  %1097 = vmatmul.mubr.msk.f32.gmra.mrb[2].mxu0 %vm73_vm1, %v1308_v55 }
  0xa2   :  { %1144 = vmatpush3.bf16.msra.mxu1 %v1292_v40  ;;  %1036 = vmatprep.mubr.msk.f32.mxu1 %vm73_vm1, %v1296_v47 }
  0xa3   :  { %1099 = vmatprep.mubr.msk.f32.mxu0 %vm73_vm1, %v1325_v3  ;;  %1146 = vmatprep.subr.bf16.mxu1 %v1294_v41 }
  0xa4   :  { %1172 = vmatpush3.bf16.msra.mxu0 %v1266_v17 }
  0xa5   :  { %1037 = vmatmul.mubr.msk.f32.gmra.mrb[2].mxu1 %vm73_vm1, %v1308_v55  ;;  %1100 = vmatmul.mubr.msk.f32.gmra.mrb[4].mxu0 %vm73_vm1, %v1323_v2 }
  0xa6   :  { %1039 = vmatprep.mubr.msk.f32.mxu1 %vm73_vm1, %v1325_v3  ;;  %1102 = vmatprep.mubr.msk.f32.mxu0 %vm73_vm1, %v1343_v19 }
  0xa7   :  { %1148 = vmatpush3.bf16.msra.mxu1 %v1294_v41 }
  0xa9   :  { %1040 = vmatmul.mubr.msk.f32.gmra.mrb[4].mxu1 %vm73_vm1, %v1323_v2  ;;  %1103 = vmatmul.mubr.msk.f32.gmra.mrb[6].mxu0 %vm73_vm1, %v1341_v18 }
  0xaa   :  { %1042 = vmatprep.mubr.msk.f32.mxu1 %vm73_vm1, %v1343_v19  ;;  %1113 = vmatprep.mubr.msk.f32.mxu0 %vm73_vm1, %v1298_v48 }
  0xad   :  { %1043 = vmatmul.mubr.msk.f32.gmra.mrb[6].mxu1 %vm73_vm1, %v1341_v18  ;;  %1114 = vmatmul.mubr.msk.f32.vlgmr.msra.gmra.mrb[0].mxu0 %vm73_vm1, %v1310_v56 }
  0xae   :  { %1053 = vmatprep.mubr.f32.mxu1 %v1306_v52  ;;  %1116 = vmatprep.mubr.msk.f32.mxu0 %vm73_vm1, %v1296_v47 }
  0xb1   :  { %1054 = vmatmul.mubr.f32.vlgmr.msra.gmra.mrb[0].mxu1 %v1320_v62  ;;  %1117 = vmatmul.mubr.msk.f32.gmra.mrb[2].mxu0 %vm73_vm1, %v1308_v55 }
  0xb2   :  { %1056 = vmatprep.mubr.f32.mxu1 %v1304_v51  ;;  %1119 = vmatprep.mubr.msk.f32.mxu0 %vm73_vm1, %v1325_v3 }
  0xb5   :  { %1057 = vmatmul.mubr.f32.gmra.mrb[2].mxu1 %v1318_v61  ;;  %1120 = vmatmul.mubr.msk.f32.gmra.mrb[4].mxu0 %vm73_vm1, %v1323_v2 }
  0xb6   :  { %1059 = vmatprep.mubr.f32.mxu1 %v1336_v11  ;;  %1122 = vmatprep.mubr.msk.f32.mxu0 %vm73_vm1, %v1343_v19 }
  0xb9   :  { %1060 = vmatmul.mubr.f32.gmra.mrb[4].mxu1 %v1334_v10  ;;  %1123 = vmatmul.mubr.msk.f32.gmra.mrb[6].mxu0 %vm73_vm1, %v1341_v18 }
  0xba   :  { %1062 = vmatprep.mubr.f32.mxu1 %v1354_v27 }
  0xbd   :  { %1063 = vmatmul.mubr.f32.gmra.mrb[6].mxu1 %v1352_v26 }
 0x180   :  { %v1115_v16 = vpop.f32.mrb[0].mxu0 }
 0x181   :  { %v842_v17 = vpop.f32.mrb[1].mxu0 }
 0x184   :  { %v1055_v39 = vpop.f32.mrb[0].mxu1  ;;  %v1118_v40 = vpop.f32.mrb[2].mxu0 }
 0x185   :  { %v1173_v41 = vadd.f32 %v1115_v16, %v1055_v39  ;;  %v460_v42 = vpop.f32.mrb[1].mxu1  ;;  %v854_v43 = vpop.f32.mrb[3].mxu0 }
 0x186   :  { %v1174_v44 = vadd.f32 %v842_v17, %v460_v42 }
 0x187   :  { %890 = vst.msk [vmem:[%s1464_s2 + $0x8] sm:$0xff] %vm888_vm10, %v1173_v41 }
 0x188   :  { %889 = vst.msk [vmem:[%s1464_s2] sm:$0xff] %vm888_vm10, %v1174_v44  ;;  %v1058_v45 = vpop.f32.mrb[2].mxu1  ;;  %v1121_v46 = vpop.f32.mrb[4].mxu0 }
 0x189   :  { %v1175_v47 = vadd.f32 %v1118_v40, %v1058_v45  ;;  %v474_v48 = vpop.f32.mrb[3].mxu1  ;;  %v866_v49 = vpop.f32.mrb[5].mxu0 }
 0x18a   :  { %v1176_v50 = vadd.f32 %v854_v43, %v474_v48 }
 0x18b   :  { %892 = vst.msk [vmem:[%s1464_s2 + $0x18] sm:$0xff] %vm888_vm10, %v1175_v47 }
 0x18c   :  { %891 = vst.msk [vmem:[%s1464_s2 + $0x10] sm:$0xff] %vm888_vm10, %v1176_v50  ;;  %v1061_v51 = vpop.f32.mrb[4].mxu1  ;;  %v1124_v52 = vpop.f32.mrb[6].mxu0 }
 0x18d   :  { %v1177_v53 = vadd.f32 %v1121_v46, %v1061_v51  ;;  %v488_v54 = vpop.f32.mrb[5].mxu1  ;;  %v878_v55 = vpop.f32.mrb[7].mxu0 }
 0x18e   :  { %v1178_v56 = vadd.f32 %v866_v49, %v488_v54 }
 0x18f   :  { %894 = vst.msk [vmem:[%s1464_s2 + $0x28] sm:$0xff] %vm888_vm10, %v1177_v53 }
 0x190   :  { %893 = vst.msk [vmem:[%s1464_s2 + $0x20] sm:$0xff] %vm888_vm10, %v1178_v56  ;;  %v1064_v57 = vpop.f32.mrb[6].mxu1 }
 0x191   :  { %v1179_v58 = vadd.f32 %v1124_v52, %v1064_v57  ;;  %v502_v59 = vpop.f32.mrb[7].mxu1 }
 0x192   :  { %v1180_v60 = vadd.f32 %v878_v55, %v502_v59 }
 0x193   :  { %896 = vst.msk [vmem:[%s1464_s2 + $0x38] sm:$0xff] %vm888_vm10, %v1179_v58 }
 0x194   :  { %895 = vst.msk [vmem:[%s1464_s2 + $0x30] sm:$0xff] %vm888_vm10, %v1180_v60 }

</bundles_post_ra>
